<compile_context>
chip_gen: v6e
topology: v6e:2x2x1
jax: 0.10.0
libtpu: 0.0.40
codegen_flags: <defaults>
</compile_context>

<pallas_src>
import jax
import jax.numpy as jnp
from jax.experimental import pallas as pl
from jax.experimental.pallas import tpu as pltpu


def _round_up(x, m):
    return ((x + m - 1) // m) * m


def _vmem_capacity_bytes():
    try:
        return int(pltpu.get_tpu_info().vmem_capacity_bytes)
    except Exception:
        return 64 << 20  # conservative (v7x-sized) fallback


def _usable_vmem_bytes():
    cap = _vmem_capacity_bytes()
    # Leave headroom for Mosaic-internal scratch: ~48 MiB usable on v7x
    # (64 MiB physical), ~100 MiB on v5e/v6e (128 MiB physical).
    return max(32 << 20, min(cap - (16 << 20), 100 << 20))


def _pick_tk(K, cap=512):
    """Reduction tile: must divide K exactly and be a multiple of 128 (or K)."""
    if K <= cap:
        return K
    t = (cap // 128) * 128
    while t >= 128:
        if K % t == 0:
            return t
        t -= 128
    return K  # no nice divisor -> keep full K resident (rare / pathological)


def dense_kernel(x_ref, w_ref, b_ref, o_ref, acc_ref):
    # x_ref: (tm, tk)  w_ref: (tk, tn)  b_ref: (1, tn)
    # o_ref: (tm, tn)  acc_ref: (tm, tn) f32 scratch (persists across k steps)
    k = pl.program_id(2)

    @pl.when(k == 0)
    def _():
        acc_ref[...] = jnp.zeros_like(acc_ref)

    acc_ref[...] += jnp.dot(
        x_ref[...].astype(w_ref.dtype), w_ref[...],
        preferred_element_type=jnp.float32)

    @pl.when(k == pl.num_programs(2) - 1)
    def _():
        o_ref[...] = jnp.maximum(acc_ref[...] + b_ref[...], 0.0).astype(o_ref.dtype)


def prepare_dense_params(w, b, *, tn=None, compute_dtype=None):
    """One-time weight/bias prep: dtype cast + pad N up to a multiple of tn."""
    K, N = w.shape
    compute_dtype = compute_dtype or w.dtype
    tn = tn or min(_round_up(N, 128), 512)
    tn = max(128, _round_up(tn, 128))
    Np = _round_up(N, tn)
    wp = w.astype(compute_dtype)
    bp = jnp.zeros((N,), jnp.float32) if b is None else b.astype(jnp.float32)
    if Np != N:
        wp = jnp.pad(wp, ((0, 0), (0, Np - N)))
        bp = jnp.pad(bp, (0, Np - N))
    return wp, bp.reshape(1, Np), N, tn


def dense_apply(x, wp, b2, n_out, *, tn, tm=None, tk=None, out_dtype=None):
    """relu(x @ wp + b2) with prepared (cast, N-padded) weight/bias."""
    M, K = x.shape
    Kw, Np = wp.shape
    assert K == Kw and b2.shape == (1, Np) and Np % tn == 0

    out_dtype = out_dtype or x.dtype
    tk = tk or _pick_tk(K)

    x_item = jnp.dtype(x.dtype).itemsize
    w_item = jnp.dtype(wp.dtype).itemsize
    out_item = jnp.dtype(out_dtype).itemsize

    # --- tile sizing from the device VMEM budget ----------------------------
    usable = _usable_vmem_bytes()
    # Every input is double-buffered by default; accumulator is single.
    resident = 2 * tk * tn * w_item + 2 * tn * 4           # weight tile + bias
    per_row = 2 * tk * x_item + 2 * tn * out_item + tn * 4  # x + out + acc
    budget = max(usable - resident - (4 << 20), 8 * per_row)
    tm_cap = max(8, budget // per_row)

    tm = tm or 512
    tm = int(min(tm, tm_cap, _round_up(M, 8)))
    if tm >= 256 and M >= 256:
        tm = (tm // 256) * 256       # align to MXU height on v6e/v7x
    else:
        tm = max(8, (tm // 8) * 8)

    grid_j = Np // tn
    grid_k = pl.cdiv(K, tk)
    grid_i = pl.cdiv(M, tm)
    # Keep both TensorCores busy on dual-TC chips when there is enough work.
    if grid_i * grid_j < 2 and M > 256:
        tm = _round_up(pl.cdiv(M, 2), 128)
        grid_i = pl.cdiv(M, tm)

    vmem_est = resident + tm * per_row + (2 << 20)
    vmem_limit = int(min(max(vmem_est, 16 << 20), usable))

    return pl.pallas_call(
        dense_kernel,
        out_shape=jax.ShapeDtypeStruct((M, n_out), out_dtype),
        grid_spec=pltpu.PrefetchScalarGridSpec(
            num_scalar_prefetch=0,
            grid=(grid_i, grid_j, grid_k),
            in_specs=[
                pl.BlockSpec((tm, tk), lambda i, j, k: (i, k)),   # x row tile
                pl.BlockSpec((tk, tn), lambda i, j, k: (k, j)),   # weight tile
                pl.BlockSpec((1, tn), lambda i, j, k: (0, j)),    # bias tile
            ],
            out_specs=pl.BlockSpec((tm, tn), lambda i, j, k: (i, j)),
            scratch_shapes=[pltpu.VMEM((tm, tn), jnp.float32)],
        ),
        compiler_params=pltpu.CompilerParams(
            dimension_semantics=("parallel", "parallel", "arbitrary"),
            vmem_limit_bytes=vmem_limit,
        ),
        cost_estimate=pl.CostEstimate(
            flops=2 * M * K * Np,
            transcendentals=0,
            bytes_accessed=(M * K * x_item + K * Np * w_item + Np * 4
                            + M * n_out * out_item),
        ),
    )(x, wp, b2)


def make_dense(w, b=None, *, compute_dtype=None, out_dtype=None,
               tm=None, tn=None, tk=None):
    """Prep weights once; returns forward(x) reusing the prepared params."""
    wp, b2, n_out, tn = prepare_dense_params(w, b, tn=tn, compute_dtype=compute_dtype)

    def forward(x):
        return dense_apply(x, wp, b2, n_out, tn=tn, tm=tm, tk=tk,
                           out_dtype=out_dtype)

    return forward


def dense_forward(x, w, b=None, **kwargs):
    """Convenience one-shot call (prep + apply)."""
    return make_dense(w, b, **kwargs)(x)


def dense_reference(x, w, b):
    return jnp.maximum(x @ w + b[None, :], 0.0)


if __name__ == "__main__":
    # Dense(input_size=32, output_size=64, dropout=0.0, bias=True)
    input_size, output_size = 32, 64

    key = jax.random.PRNGKey(0)
    kx, kw, kb, kx2 = jax.random.split(key, 4)

    w = jax.random.normal(kw, (input_size, output_size), dtype=jnp.float32) * 0.1
    b = jax.random.normal(kb, (output_size,), dtype=jnp.float32) * 0.1

    # TODO(synk): dropout>0 training-mode path (stateful PRNG masking) not
    # implemented; module default dropout=0.0 -> Identity, matched here.

    # Case 1: small batch, f32 operands, prep hoisted via make_dense (strict).
    batch = 8
    x = jax.random.normal(kx, (batch, input_size), dtype=jnp.float32)
    dense = make_dense(w, b)
    out = dense(x)
    jax.block_until_ready(out)
    ref = dense_reference(x, w, b)
    assert out.shape == (batch, output_size)
    assert jnp.allclose(out, ref, atol=1e-5, rtol=1e-5)

    # Case 2: batch not divisible by the tile (partial M blocks, multi-step
    # grid) with bf16 MXU operands / f32 accumulation (loose check).
    batch2 = 300
    x2 = jax.random.normal(kx2, (batch2, input_size), dtype=jnp.float32)
    out2 = dense_forward(x2, w, b, tm=128, compute_dtype=jnp.bfloat16)
    jax.block_until_ready(out2)
    ref2 = dense_reference(x2, w, b)
    assert out2.shape == (batch2, output_size)
    assert jnp.allclose(out2, ref2, atol=3e-2, rtol=3e-2)

    print("KERNEL_OK")
</pallas_src>

<mosaic_0001>
module attributes {stable_mosaic.version = 11 : i64} {
  func.func @dense_kernel(%arg0: i32, %arg1: i32, %arg2: i32, %arg3: memref<8x32xf32, #tpu.memory_space<vmem>>, %arg4: memref<32x128xf32, #tpu.memory_space<vmem>>, %arg5: memref<1x128xf32, #tpu.memory_space<vmem>>, %arg6: memref<8x128xf32, #tpu.memory_space<vmem>>, %arg7: memref<8x128xf32, #tpu.memory_space<vmem>>) attributes {dimension_semantics = [#tpu.dimension_semantics<parallel>, #tpu.dimension_semantics<parallel>, #tpu.dimension_semantics<arbitrary>], iteration_bounds = array<i64: 1, 1, 1>, scalar_prefetch = 0 : i64, scratch_operands = 1 : i64, tpu.core_type = #tpu.core_type<tc>, window_params = [{transform_indices = @transform_0, window_bounds = array<i64: 8, 32>}, {transform_indices = @transform_1, window_bounds = array<i64: 32, 128>}, {transform_indices = @transform_2, window_bounds = array<i64: 1, 128>}, {transform_indices = @transform_3, window_bounds = array<i64: 8, 128>}]} {
    %c0_i32 = arith.constant 0 : i32
    %0 = arith.cmpi eq, %arg2, %c0_i32 : i32
    %1 = arith.extui %0 : i1 to i32
    %c0_i32_0 = arith.constant 0 : i32
    %2 = arith.cmpi ne, %1, %c0_i32_0 : i32
    scf.if %2 {
      %cst_10 = arith.constant 0.000000e+00 : f32
      %12 = vector.broadcast %cst_10 : f32 to vector<8x128xf32>
      %c0_11 = arith.constant 0 : index
      %c0_12 = arith.constant 0 : index
      %13 = vector.load %arg7[%c0_11, %c0_12] : memref<8x128xf32, #tpu.memory_space<vmem>>, vector<8x128xf32>
      tpu.vector_store %arg7[%c0_11, %c0_12], %12 {strides = array<i32>} : memref<8x128xf32, #tpu.memory_space<vmem>>, vector<8x128xf32>,
    } else {
    }
    %c0 = arith.constant 0 : index
    %c0_1 = arith.constant 0 : index
    %3 = vector.load %arg7[%c0, %c0_1] : memref<8x128xf32, #tpu.memory_space<vmem>>, vector<8x128xf32>
    %c0_2 = arith.constant 0 : index
    %c0_3 = arith.constant 0 : index
    %4 = vector.load %arg3[%c0_2, %c0_3] : memref<8x32xf32, #tpu.memory_space<vmem>>, vector<8x32xf32>
    %c0_4 = arith.constant 0 : index
    %c0_5 = arith.constant 0 : index
    %5 = vector.load %arg4[%c0_4, %c0_5] : memref<32x128xf32, #tpu.memory_space<vmem>>, vector<32x128xf32>
    %cst = arith.constant dense<0.000000e+00> : vector<8x128xf32>
    %6 = tpu.matmul %4, %5, %cst {dimension_numbers = #tpu.dot_dimension_numbers<[1], [0], [0], [1], [0, 0, 1, 1], [], []>} : vector<8x32xf32>, vector<32x128xf32>, vector<8x128xf32> -> vector<8x128xf32>
    %7 = arith.addf %3, %6 : vector<8x128xf32>
    %c0_6 = arith.constant 0 : index
    %c0_7 = arith.constant 0 : index
    %8 = vector.load %arg7[%c0_6, %c0_7] : memref<8x128xf32, #tpu.memory_space<vmem>>, vector<8x128xf32>
    tpu.vector_store %arg7[%c0_6, %c0_7], %7 {strides = array<i32>} : memref<8x128xf32, #tpu.memory_space<vmem>>, vector<8x128xf32>,
    %c0_i32_8 = arith.constant 0 : i32
    %9 = arith.cmpi eq, %arg2, %c0_i32_8 : i32
    %10 = arith.extui %9 : i1 to i32
    %c0_i32_9 = arith.constant 0 : i32
    %11 = arith.cmpi ne, %10, %c0_i32_9 : i32
    scf.if %11 {
      %c0_10 = arith.constant 0 : index
      %c0_11 = arith.constant 0 : index
      %12 = vector.load %arg7[%c0_10, %c0_11] : memref<8x128xf32, #tpu.memory_space<vmem>>, vector<8x128xf32>
      %c0_12 = arith.constant 0 : index
      %c0_13 = arith.constant 0 : index
      %13 = vector.load %arg5[%c0_12, %c0_13] : memref<1x128xf32, #tpu.memory_space<vmem>>, vector<1x128xf32>
      %14 = vector.broadcast %13 : vector<1x128xf32> to vector<8x128xf32>
      %15 = arith.addf %12, %14 : vector<8x128xf32>
      %cst_14 = arith.constant 0.000000e+00 : f32
      %16 = vector.broadcast %cst_14 : f32 to vector<8x128xf32>
      %17 = arith.maximumf %15, %16 : vector<8x128xf32>
      %c0_15 = arith.constant 0 : index
      %c0_16 = arith.constant 0 : index
      %18 = vector.load %arg6[%c0_15, %c0_16] : memref<8x128xf32, #tpu.memory_space<vmem>>, vector<8x128xf32>
      tpu.vector_store %arg6[%c0_15, %c0_16], %17 {strides = array<i32>} : memref<8x128xf32, #tpu.memory_space<vmem>>, vector<8x128xf32>,
    } else {
    }
    return
  }
  func.func @transform_0(%arg0: i32, %arg1: i32, %arg2: i32) -> (i32, i32) {
    %c0_i32 = arith.constant 0 : i32
    return %arg0, %arg2 : i32, i32
  }
  func.func @transform_1(%arg0: i32, %arg1: i32, %arg2: i32) -> (i32, i32) {
    %c0_i32 = arith.constant 0 : i32
    return %arg2, %arg1 : i32, i32
  }
  func.func @transform_2(%arg0: i32, %arg1: i32, %arg2: i32) -> (i32, i32) {
    %c0_i32 = arith.constant 0 : i32
    %c0_i32_0 = arith.constant 0 : i32
    return %c0_i32, %arg1 : i32, i32
  }
  func.func @transform_3(%arg0: i32, %arg1: i32, %arg2: i32) -> (i32, i32) {
    %c0_i32 = arith.constant 0 : i32
    return %arg0, %arg1 : i32, i32
  }
}

</mosaic_0001>

<bundles_post_ra>
// kernel: tpu_custom_call.1
= control target key start
LH: loop header
LB: loop body
LE: loop exit
PB: predicated region body
PF: predicated region fallthrough
CT: control target
= control target key end

     0   :  { %8 = vsyncpa [#allocation4], 0  ;;  %s288_s0 = inlined_call_operand.hbm [shape: f32[8,32], index: 0, kind: input, shape index: {}]   ;;  %s289_s1 = inlined_call_operand.hbm [shape: f32[32,128], index: 1, kind: input, shape index: {}]   ;;  %s290_s2 = inlined_call_operand.vmem [shape: f32[1,128], index: 2, kind: input, shape index: {}]   ;;  %s291_s3 = inlined_call_operand.hbm [shape: f32[8,64], index: 3, kind: output, shape index: {}]  }
   0x1   :  { %9 = vsyncpa [#allocation7], 0 }
   0x2   :  { %10 = vsyncpa [#allocation5], 0  ;;  %s249_s12 = smov [#allocation3]   ;;  %s250_s14 = smov [#allocation6]  }
   0x3   :  { %s17_s13 = sshll.u32 %s249_s12, 4  ;;  %s26_s15 = sshll.u32 %s250_s14, 4  ;;  %s18_s13 = int_to_ptr.vmem [resolvable:$true] %s17_s13  ;;  %s27_s15 = int_to_ptr.vmem [resolvable:$true] %s26_s15 }
   0x4   :  { %s191_s16 = scalar_lea.vmem %s18_s13, 128  ;;  %p196_p1 = scmp.lt.s32.totalorder %s18_s13, %s18_s13 }
   0x5   :  { %p192_p0 = scmp.ne.s32.totalorder %s18_s13, %s191_s16  ;;  %p197_p2 = scmp.lt.s32.totalorder %s191_s16, %s191_s16 }
   0x7   :  { %p198_p3 = por %p197_p2, %p196_p1 }
   0x9   :  { %p199_p4 = pnand %p198_p3, %p192_p0 }
   0xb   :  { %202 = shalt.err (!%p199_p4)
}
   0xc   :  { %20 = dma.hbm_to_vmem [thread:$0]  %s288_s0, 128, %s18_s13, [#allocation4]  }
   0xd   :  { %s211_s19 = scalar_lea.vmem %s27_s15, 512  ;;  %p216_p6 = scmp.lt.s32.totalorder %s27_s15, %s27_s15 }
   0xe   :  { %p212_p5 = scmp.ne.s32.totalorder %s27_s15, %s211_s19  ;;  %p217_p7 = scmp.lt.s32.totalorder %s211_s19, %s211_s19 }
  0x10   :  { %p218_p8 = por %p217_p7, %p216_p6 }
  0x12   :  { %p219_p9 = pnand %p218_p8, %p212_p5 }
  0x14   :  { %222 = shalt.err (!%p219_p9)
}
  0x15   :  { %s251_s20 = smov 128   ;;  %s252_s21 = smov 8  }
  0x16   :  { %32 = dma.hbm_to_vmem [thread:$0]  %s289_s1, 512, %s27_s15, [#allocation7], %s251_s20, %s251_s20, %s252_s21  }
  0x17   :  { %243 = dma.done.wait [#allocation4], 128  }
  0x18   :  { %244 = vsyncadd [#allocation4], 4294967168 }
  0x19   :  { %245 = dma.done.wait [#allocation7], 512  }
  0x1a   :  { %246 = vsyncadd [#allocation7], 4294966784  ;;  %v253_v0 = vmov 0.0   ;;  %vm254_vm0 = vmmov 0   ;;  %v51_v1 = vld [vmem:[#allocation6 + $0x18] sm:$0xff]  ;;  %v50_v2 = vld [vmem:[#allocation6 + $0x10] sm:$0xff] }
  0x1b   :  { %165 = vmatprep.subr.mxu0 %v253_v0  ;;  %173 = vmatprep.mubr.msk.f32.mxu0 %vm254_vm0, %v253_v0  ;;  %v49_v3 = vld [vmem:[#allocation6 + $0x8] sm:$0xff]  ;;  %v48_v4 = vld [vmem:[#allocation6] sm:$0xff]  ;;  %v47_v5 = vld [vmem:[#allocation3] sm:$0xff]  ;;  %vm52_vm1 = vcmask 261120   ;;  %s255_s24 = smov [#allocation8]  }
  0x1c   :  { %166 = vmatpush3.msra.mxu0 %v51_v1  ;;  %v159_v6 = vld [vmem:[%s290_s2] ss:$0 sm:$0xff]  ;;  %s148_s25 = sshll.u32 %s255_s24, 4  ;;  %s149_s25 = int_to_ptr.vmem [resolvable:$true] %s148_s25 }
  0x1d   :  { %167 = vmatprep.subr.mxu0 %v253_v0  ;;  %s223_s26 = scalar_lea.vmem %s149_s25, 128  ;;  %p228_p11 = scmp.lt.s32.totalorder %s149_s25, %s149_s25 }
  0x1e   :  { %168 = vmatpush3.msra.mxu0 %v50_v2  ;;  %p224_p10 = scmp.ne.s32.totalorder %s149_s25, %s223_s26  ;;  %p229_p12 = scmp.lt.s32.totalorder %s223_s26, %s223_s26 }
  0x1f   :  { %169 = vmatprep.subr.mxu0 %v253_v0 }
  0x20   :  { %170 = vmatpush3.msra.mxu0 %v49_v3  ;;  %p230_p13 = por %p229_p12, %p228_p11 }
  0x21   :  { %171 = vmatprep.subr.mxu0 %v253_v0 }
  0x22   :  { %172 = vmatpush3.msra.mxu0 %v48_v4  ;;  %p231_p0 = pnand %p230_p13, %p224_p10 }
  0x23   :  { %174 = vmatmul.mubr.msk.f32.vlgmr.msra.gmra.mxu0 %vm52_vm1, %v47_v5 }
  0xe3   :  { %v122_v7 = vpop.f32.mrf.mxu0 }
  0xe4   :  { %v139_v8 = vadd.f32 %v159_v6, %v122_v7 }
  0xe5   :  { %v175_v9 = vpop.f32.mrf.mxu0 }
  0xe6   :  { %v140_v10 = vmax.f32 %v139_v8, 0.0 }
  0xe8   :  { %141 = vst [vmem:[#allocation8] sm:$0xff] %v140_v10 }
  0xe9   :  { %234 = shalt.err (!%p231_p0)
}
  0xea   :  { %151 = dma.vmem_to_hbm [thread:$0]  %s149_s25, 128, %s291_s3, [#allocation5]  }
  0xeb   :  { %247 = dma.done.wait [#allocation5], 128  }
  0xec   :  { %248 = vsyncadd [#allocation5], 4294967168 }
  0xed   :  { %155 = vsyncpa [#allocation4], 1 }
  0xee   :  { %156 = vsyncpa [#allocation7], 1 }
  0xef   :  { %157 = vsyncpa [#allocation5], 1 }

</bundles_post_ra>
